<compile_context>
chip_gen: v5e
topology: v5e:2x2
jax: 0.10.0
libtpu: 0.0.40
codegen_flags: <defaults>
</compile_context>

<pallas_src>
import jax
import jax.numpy as jnp
from jax.experimental import pallas as pl
from jax.experimental.pallas import tpu as pltpu

_MIB = 1024 * 1024


def _round_up(x, m):
    return (x + m - 1) // m * m


def _choose_tiles(batch, in_features, out_features, *, tm=None, tn=None, tk=None,
                  use_bf16=False):
    """Per-generation tile sizes + scoped-VMEM limit."""
    try:
        vmem_cap = int(pltpu.get_tpu_info().vmem_capacity_bytes)
    except Exception:
        vmem_cap = 64 * _MIB  # conservative fallback (v7x-sized)

    if vmem_cap >= 128 * _MIB:          # v5e / v6e: 128 MiB VMEM
        tm_d, tn_d, tk_d = 512, 512, 2048
    else:                               # v7x: 64 MiB VMEM per TensorCore
        tm_d, tn_d, tk_d = 256, 256, 1024

    tm = tm_d if tm is None else tm
    tn = tn_d if tn is None else tn
    tk = tk_d if tk is None else tk

    # Round user-supplied tiles to hardware alignment (robustness: never emit a
    # BlockSpec that violates the (8,128) divisibility rule).
    sub = 16 if use_bf16 else 8
    tm = _round_up(max(int(tm), sub), sub)
    tn = _round_up(max(int(tn), 128), 128)
    tk = _round_up(max(int(tk), 128), 128)

    # Clamp to the (padded) problem size.
    tm = min(tm, _round_up(batch, sub))
    tn = min(tn, _round_up(out_features, 128))
    tk = min(tk, _round_up(in_features, 128))

    # v7x has 2 TensorCores; the grid only shards across them on "parallel"
    # axes.  If the whole batch fits in one M block, split N into >= 2 blocks
    # when possible so the second core has work.  Harmless on 1-TC chips.
    n128 = _round_up(out_features, 128)
    if _round_up(batch, sub) <= tm and tn >= n128 and n128 >= 256:
        tn = _round_up(n128 // 2, 128)

    vmem_limit = max(32 * _MIB, min(vmem_cap - 16 * _MIB, 96 * _MIB))
    return (tm, tn, tk), vmem_limit


def prepare_complex_linear_params(w_r, w_i, b_r, b_i, *, tiles, use_bf16=False):
    """One-time (parameter-init-time) padding + bias folding.

    w_r, w_i: (in_features, out_features)  -- already transposed from torch's
              (out, in) nn.Linear layout.
    b_r, b_i: (out_features,)
    """
    _, tn, tk = tiles
    K, N = w_r.shape
    Kp = _round_up(K, tk)
    Np = _round_up(N, tn)
    wdt = jnp.bfloat16 if use_bf16 else jnp.float32

    wr_p = jnp.zeros((Kp, Np), wdt).at[:K, :N].set(w_r.astype(wdt))
    wi_p = jnp.zeros((Kp, Np), wdt).at[:K, :N].set(w_i.astype(wdt))
    # Folded biases: real gets (b_r - b_i), imag gets (b_r + b_i).
    br_f = jnp.zeros((1, Np), jnp.float32).at[0, :N].set((b_r - b_i).astype(jnp.float32))
    bi_f = jnp.zeros((1, Np), jnp.float32).at[0, :N].set((b_r + b_i).astype(jnp.float32))
    return wr_p, wi_p, br_f, bi_f, (K, N)


def _complex_linear_kernel(xr_ref, xi_ref, wr_ref, wi_ref, br_ref, bi_ref,
                           or_ref, oi_ref):
    """One grid step.

    xr_ref, xi_ref : (tm, tk)   real / imag activation tiles
    wr_ref, wi_ref : (tk, tn)   real / imag weight tiles
    br_ref, bi_ref : (1, tn)    folded biases (b_r - b_i), (b_r + b_i)
    or_ref, oi_ref : (tm, tn)   f32 output blocks, resident across the K axis
                                and used directly as accumulators.
    """
    tm, tn = or_ref.shape

    # Initialize the accumulators with the folded biases on the first K step.
    @pl.when(pl.program_id(2) == 0)
    def _init():
        or_ref[...] = jnp.broadcast_to(br_ref[...], (tm, tn))
        oi_ref[...] = jnp.broadcast_to(bi_ref[...], (tm, tn))

    # Stack real/imag rows in VMEM once, share the LHS across two MXU dots.
    x = jnp.concatenate([xr_ref[...], xi_ref[...]], axis=0)          # (2tm, tk)
    pr = jnp.dot(x, wr_ref[...], preferred_element_type=jnp.float32)  # [xr@wr ; xi@wr]
    pi = jnp.dot(x, wi_ref[...], preferred_element_type=jnp.float32)  # [xr@wi ; xi@wi]

    or_ref[...] += pr[:tm, :] - pi[tm:, :]   # real = xr@wr - xi@wi (+ br - bi)
    oi_ref[...] += pr[tm:, :] + pi[:tm, :]   # imag = xi@wr + xr@wi (+ br + bi)


def complex_linear_planar(xr, xi, params, *, tiles, vmem_limit_bytes,
                          use_bf16=False):
    """Planar-in / planar-out complex linear.  xr, xi: (B, in_features)."""
    wr_p, wi_p, br_f, bi_f, (K, N) = params
    tm, tn, tk = tiles
    B = xr.shape[0]
    Kp, Np = wr_p.shape
    Bp = _round_up(B, tm)

    xdt = jnp.bfloat16 if use_bf16 else jnp.float32
    xr_p = xr.astype(xdt)
    xi_p = xi.astype(xdt)
    if (B, K) != (Bp, Kp):
        xr_p = jnp.zeros((Bp, Kp), xdt).at[:B, :K].set(xr_p)
        xi_p = jnp.zeros((Bp, Kp), xdt).at[:B, :K].set(xi_p)

    nbm, nbn, nbk = Bp // tm, Np // tn, Kp // tk

    in_bytes = 2 if use_bf16 else 4
    flops = 8 * Bp * Kp * Np
    bytes_accessed = (nbn * 2 * Bp * Kp * in_bytes       # xr + xi, re-read per N block
                      + nbm * 2 * Kp * Np * in_bytes     # wr + wi, re-read per M block
                      + 2 * Bp * Np * 4                  # out_r + out_i
                      + nbm * nbk * 2 * Np * 4)          # folded biases

    out_r, out_i = pl.pallas_call(
        _complex_linear_kernel,
        out_shape=(jax.ShapeDtypeStruct((Bp, Np), jnp.float32),
                   jax.ShapeDtypeStruct((Bp, Np), jnp.float32)),
        grid_spec=pltpu.PrefetchScalarGridSpec(
            num_scalar_prefetch=0,
            grid=(nbm, nbn, nbk),
            in_specs=[
                pl.BlockSpec((tm, tk), lambda i, j, k: (i, k)),   # xr
                pl.BlockSpec((tm, tk), lambda i, j, k: (i, k)),   # xi
                pl.BlockSpec((tk, tn), lambda i, j, k: (k, j)),   # wr
                pl.BlockSpec((tk, tn), lambda i, j, k: (k, j)),   # wi
                pl.BlockSpec((1, tn), lambda i, j, k: (0, j)),    # b_r - b_i
                pl.BlockSpec((1, tn), lambda i, j, k: (0, j)),    # b_r + b_i
            ],
            out_specs=[
                pl.BlockSpec((tm, tn), lambda i, j, k: (i, j)),
                pl.BlockSpec((tm, tn), lambda i, j, k: (i, j)),
            ],
        ),
        compiler_params=pltpu.CompilerParams(
            dimension_semantics=("parallel", "parallel", "arbitrary"),
            vmem_limit_bytes=int(vmem_limit_bytes),
        ),
        cost_estimate=pl.CostEstimate(
            flops=flops, transcendentals=0, bytes_accessed=bytes_accessed),
    )(xr_p, xi_p, wr_p, wi_p, br_f, bi_f)

    return out_r[:B, :N], out_i[:B, :N]


def complex_linear(x_complex, params, *, tiles, vmem_limit_bytes, use_bf16=False):
    """Convenience complex64-in / complex64-out wrapper."""
    xr = jnp.real(x_complex).astype(jnp.float32)
    xi = jnp.imag(x_complex).astype(jnp.float32)
    out_r, out_i = complex_linear_planar(
        xr, xi, params, tiles=tiles, vmem_limit_bytes=vmem_limit_bytes,
        use_bf16=use_bf16)
    return jax.lax.complex(out_r, out_i)


def _reference(x_complex, w_r, w_i, b_r, b_i):
    xr = jnp.real(x_complex)
    xi = jnp.imag(x_complex)
    fc_r = lambda t: t @ w_r + b_r
    fc_i = lambda t: t @ w_i + b_i
    return jax.lax.complex(fc_r(xr) - fc_i(xi), fc_r(xi) + fc_i(xr))


if __name__ == "__main__":
    key = jax.random.PRNGKey(0)
    B, in_features, out_features = 8, 32, 32

    k_xr, k_xi, k_wr, k_wi, k_br, k_bi = jax.random.split(key, 6)
    bound = 1.0 / (in_features ** 0.5)
    w_r = jax.random.uniform(k_wr, (in_features, out_features),
                             minval=-bound, maxval=bound, dtype=jnp.float32)
    w_i = jax.random.uniform(k_wi, (in_features, out_features),
                             minval=-bound, maxval=bound, dtype=jnp.float32)
    b_r = jax.random.uniform(k_br, (out_features,),
                             minval=-bound, maxval=bound, dtype=jnp.float32)
    b_i = jax.random.uniform(k_bi, (out_features,),
                             minval=-bound, maxval=bound, dtype=jnp.float32)

    xr = jax.random.normal(k_xr, (B, in_features), dtype=jnp.float32)
    xi = jax.random.normal(k_xi, (B, in_features), dtype=jnp.float32)
    x = jax.lax.complex(xr, xi)  # complex64 input, like torch.complex input

    # Tiles / VMEM limit chosen once per (shape, generation); weight padding +
    # bias folding done once at parameter-init time (hoisted off the call path).
    tiles, vmem_limit = _choose_tiles(B, in_features, out_features)
    params = prepare_complex_linear_params(w_r, w_i, b_r, b_i, tiles=tiles)

    out = complex_linear(x, params, tiles=tiles, vmem_limit_bytes=vmem_limit)
    out = jax.block_until_ready(out)

    ref = _reference(x, w_r, w_i, b_r, b_i)
    assert out.shape == (B, out_features) and out.dtype == jnp.complex64
    assert jnp.allclose(out, ref, atol=1e-4, rtol=1e-4)

    print("KERNEL_OK")
</pallas_src>

<mosaic_0001>
module attributes {stable_mosaic.version = 11 : i64} {
  func.func @_complex_linear_kernel(%arg0: i32, %arg1: i32, %arg2: i32, %arg3: memref<8x128xf32, #tpu.memory_space<vmem>>, %arg4: memref<8x128xf32, #tpu.memory_space<vmem>>, %arg5: memref<128x128xf32, #tpu.memory_space<vmem>>, %arg6: memref<128x128xf32, #tpu.memory_space<vmem>>, %arg7: memref<1x128xf32, #tpu.memory_space<vmem>>, %arg8: memref<1x128xf32, #tpu.memory_space<vmem>>, %arg9: memref<8x128xf32, #tpu.memory_space<vmem>>, %arg10: memref<8x128xf32, #tpu.memory_space<vmem>>) attributes {dimension_semantics = [#tpu.dimension_semantics<parallel>, #tpu.dimension_semantics<parallel>, #tpu.dimension_semantics<arbitrary>], iteration_bounds = array<i64: 1, 1, 1>, scalar_prefetch = 0 : i64, scratch_operands = 0 : i64, tpu.core_type = #tpu.core_type<tc>, window_params = [{transform_indices = @transform_0, window_bounds = array<i64: 8, 128>}, {transform_indices = @transform_1, window_bounds = array<i64: 8, 128>}, {transform_indices = @transform_2, window_bounds = array<i64: 128, 128>}, {transform_indices = @transform_3, window_bounds = array<i64: 128, 128>}, {transform_indices = @transform_4, window_bounds = array<i64: 1, 128>}, {transform_indices = @transform_5, window_bounds = array<i64: 1, 128>}, {transform_indices = @transform_6, window_bounds = array<i64: 8, 128>}, {transform_indices = @transform_7, window_bounds = array<i64: 8, 128>}]} {
    %c0_i32 = arith.constant 0 : i32
    %0 = arith.cmpi eq, %arg2, %c0_i32 : i32
    %1 = arith.extui %0 : i1 to i32
    %c0_i32_0 = arith.constant 0 : i32
    %2 = arith.cmpi ne, %1, %c0_i32_0 : i32
    scf.if %2 {
      %c0_17 = arith.constant 0 : index
      %c0_18 = arith.constant 0 : index
      %22 = vector.load %arg7[%c0_17, %c0_18] : memref<1x128xf32, #tpu.memory_space<vmem>>, vector<1x128xf32>
      %23 = vector.shape_cast %22 : vector<1x128xf32> to vector<1x128xf32>
      %24 = vector.broadcast %23 : vector<1x128xf32> to vector<8x128xf32>
      %c0_19 = arith.constant 0 : index
      %c0_20 = arith.constant 0 : index
      %25 = vector.load %arg9[%c0_19, %c0_20] : memref<8x128xf32, #tpu.memory_space<vmem>>, vector<8x128xf32>
      tpu.vector_store %arg9[%c0_19, %c0_20], %24 {strides = array<i32>} : memref<8x128xf32, #tpu.memory_space<vmem>>, vector<8x128xf32>,
      %c0_21 = arith.constant 0 : index
      %c0_22 = arith.constant 0 : index
      %26 = vector.load %arg8[%c0_21, %c0_22] : memref<1x128xf32, #tpu.memory_space<vmem>>, vector<1x128xf32>
      %27 = vector.shape_cast %26 : vector<1x128xf32> to vector<1x128xf32>
      %28 = vector.broadcast %27 : vector<1x128xf32> to vector<8x128xf32>
      %c0_23 = arith.constant 0 : index
      %c0_24 = arith.constant 0 : index
      %29 = vector.load %arg10[%c0_23, %c0_24] : memref<8x128xf32, #tpu.memory_space<vmem>>, vector<8x128xf32>
      tpu.vector_store %arg10[%c0_23, %c0_24], %28 {strides = array<i32>} : memref<8x128xf32, #tpu.memory_space<vmem>>, vector<8x128xf32>,
    } else {
    }
    %c0 = arith.constant 0 : index
    %c0_1 = arith.constant 0 : index
    %3 = vector.load %arg3[%c0, %c0_1] : memref<8x128xf32, #tpu.memory_space<vmem>>, vector<8x128xf32>
    %c0_2 = arith.constant 0 : index
    %c0_3 = arith.constant 0 : index
    %4 = vector.load %arg4[%c0_2, %c0_3] : memref<8x128xf32, #tpu.memory_space<vmem>>, vector<8x128xf32>
    %5 = tpu.concatenate %3, %4 in 0 : vector<8x128xf32>, vector<8x128xf32> -> vector<16x128xf32>
    %c0_4 = arith.constant 0 : index
    %c0_5 = arith.constant 0 : index
    %6 = vector.load %arg5[%c0_4, %c0_5] : memref<128x128xf32, #tpu.memory_space<vmem>>, vector<128x128xf32>
    %cst = arith.constant dense<0.000000e+00> : vector<16x128xf32>
    %7 = tpu.matmul %5, %6, %cst {dimension_numbers = #tpu.dot_dimension_numbers<[1], [0], [0], [1], [0, 0, 1, 1], [], []>} : vector<16x128xf32>, vector<128x128xf32>, vector<16x128xf32> -> vector<16x128xf32>
    %c0_6 = arith.constant 0 : index
    %c0_7 = arith.constant 0 : index
    %8 = vector.load %arg6[%c0_6, %c0_7] : memref<128x128xf32, #tpu.memory_space<vmem>>, vector<128x128xf32>
    %cst_8 = arith.constant dense<0.000000e+00> : vector<16x128xf32>
    %9 = tpu.matmul %5, %8, %cst_8 {dimension_numbers = #tpu.dot_dimension_numbers<[1], [0], [0], [1], [0, 0, 1, 1], [], []>} : vector<16x128xf32>, vector<128x128xf32>, vector<16x128xf32> -> vector<16x128xf32>
    %c0_9 = arith.constant 0 : index
    %c0_10 = arith.constant 0 : index
    %10 = vector.load %arg9[%c0_9, %c0_10] : memref<8x128xf32, #tpu.memory_space<vmem>>, vector<8x128xf32>
    %11 = vector.extract_strided_slice %7 {offsets = [0, 0], sizes = [8, 128], strides = [1, 1]} : vector<16x128xf32> to vector<8x128xf32>
    %12 = vector.extract_strided_slice %9 {offsets = [8, 0], sizes = [8, 128], strides = [1, 1]} : vector<16x128xf32> to vector<8x128xf32>
    %13 = arith.subf %11, %12 : vector<8x128xf32>
    %14 = arith.addf %10, %13 : vector<8x128xf32>
    %c0_11 = arith.constant 0 : index
    %c0_12 = arith.constant 0 : index
    %15 = vector.load %arg9[%c0_11, %c0_12] : memref<8x128xf32, #tpu.memory_space<vmem>>, vector<8x128xf32>
    tpu.vector_store %arg9[%c0_11, %c0_12], %14 {strides = array<i32>} : memref<8x128xf32, #tpu.memory_space<vmem>>, vector<8x128xf32>,
    %c0_13 = arith.constant 0 : index
    %c0_14 = arith.constant 0 : index
    %16 = vector.load %arg10[%c0_13, %c0_14] : memref<8x128xf32, #tpu.memory_space<vmem>>, vector<8x128xf32>
    %17 = vector.extract_strided_slice %7 {offsets = [8, 0], sizes = [8, 128], strides = [1, 1]} : vector<16x128xf32> to vector<8x128xf32>
    %18 = vector.extract_strided_slice %9 {offsets = [0, 0], sizes = [8, 128], strides = [1, 1]} : vector<16x128xf32> to vector<8x128xf32>
    %19 = arith.addf %17, %18 : vector<8x128xf32>
    %20 = arith.addf %16, %19 : vector<8x128xf32>
    %c0_15 = arith.constant 0 : index
    %c0_16 = arith.constant 0 : index
    %21 = vector.load %arg10[%c0_15, %c0_16] : memref<8x128xf32, #tpu.memory_space<vmem>>, vector<8x128xf32>
    tpu.vector_store %arg10[%c0_15, %c0_16], %20 {strides = array<i32>} : memref<8x128xf32, #tpu.memory_space<vmem>>, vector<8x128xf32>,
    return
  }
  func.func @transform_0(%arg0: i32, %arg1: i32, %arg2: i32) -> (i32, i32) {
    %c0_i32 = arith.constant 0 : i32
    return %arg0, %arg2 : i32, i32
  }
  func.func @transform_1(%arg0: i32, %arg1: i32, %arg2: i32) -> (i32, i32) {
    %c0_i32 = arith.constant 0 : i32
    return %arg0, %arg2 : i32, i32
  }
  func.func @transform_2(%arg0: i32, %arg1: i32, %arg2: i32) -> (i32, i32) {
    %c0_i32 = arith.constant 0 : i32
    return %arg2, %arg1 : i32, i32
  }
  func.func @transform_3(%arg0: i32, %arg1: i32, %arg2: i32) -> (i32, i32) {
    %c0_i32 = arith.constant 0 : i32
    return %arg2, %arg1 : i32, i32
  }
  func.func @transform_4(%arg0: i32, %arg1: i32, %arg2: i32) -> (i32, i32) {
    %c0_i32 = arith.constant 0 : i32
    %c0_i32_0 = arith.constant 0 : i32
    return %c0_i32, %arg1 : i32, i32
  }
  func.func @transform_5(%arg0: i32, %arg1: i32, %arg2: i32) -> (i32, i32) {
    %c0_i32 = arith.constant 0 : i32
    %c0_i32_0 = arith.constant 0 : i32
    return %c0_i32, %arg1 : i32, i32
  }
  func.func @transform_6(%arg0: i32, %arg1: i32, %arg2: i32) -> (i32, i32) {
    %c0_i32 = arith.constant 0 : i32
    return %arg0, %arg1 : i32, i32
  }
  func.func @transform_7(%arg0: i32, %arg1: i32, %arg2: i32) -> (i32, i32) {
    %c0_i32 = arith.constant 0 : i32
    return %arg0, %arg1 : i32, i32
  }
}

</mosaic_0001>

<bundles_post_ra>
// kernel: tpu_custom_call.1
= control target key start
LH: loop header
LB: loop body
LE: loop exit
PB: predicated region body
PF: predicated region fallthrough
CT: control target
= control target key end

     0   :  { %13 = vsyncpa [#allocation3], 0  ;;  %s491_s0 = inlined_call_operand.hbm [shape: f32[8,128], index: 0, kind: input, shape index: {}]   ;;  %s492_s1 = inlined_call_operand.hbm [shape: f32[8,128], index: 1, kind: input, shape index: {}]   ;;  %s493_s2 = inlined_call_operand.hbm [shape: f32[128,128], index: 2, kind: input, shape index: {}]   ;;  %s494_s3 = inlined_call_operand.hbm [shape: f32[128,128], index: 3, kind: input, shape index: {}]   ;;  %s495_s4 = inlined_call_operand.vmem [shape: f32[1,128], index: 4, kind: input, shape index: {}]   ;;  %s496_s5 = inlined_call_operand.vmem [shape: f32[1,128], index: 5, kind: input, shape index: {}]   ;;  %s497_s6 = inlined_call_operand.hbm [shape: f32[8,128], index: 6, kind: output, shape index: {0}]   ;;  %s498_s7 = inlined_call_operand.hbm [shape: f32[8,128], index: 7, kind: output, shape index: {1}]  }
   0x1   :  { %14 = vsyncpa [#allocation6], 0 }
   0x2   :  { %15 = vsyncpa [#allocation9], 0 }
   0x3   :  { %16 = vsyncpa [#allocation4], 0  ;;  %s34_s26 = sshll.u32 %s492_s1, 4  ;;  %s35_s26 = int_to_ptr.hbm [resolvable:$true] %s34_s26 }
   0x4   :  { %17 = vsyncpa [#allocation12], 0  ;;  %s419_s27 = smov [#allocation5]   ;;  %s23_s8 = sshll.u32 %s491_s0, 4  ;;  %s24_s8 = int_to_ptr.hbm [resolvable:$true] %s23_s8 }
   0x5   :  { %s36_s28 = sshll.u32 %s419_s27, 4  ;;  %s420_s9 = smov [#allocation2]   ;;  %s37_s28 = int_to_ptr.vmem [resolvable:$true] %s36_s28 }
   0x6   :  { %39 = dma.hbm_to_vmem [thread:$0]  %s35_s26, 128, %s37_s28, [#allocation6]  }
   0x7   :  { %s25_s10 = sshll.u32 %s420_s9, 4  ;;  %s44_s13 = sshll.u32 %s493_s2, 4  ;;  %s26_s10 = int_to_ptr.vmem [resolvable:$true] %s25_s10  ;;  %s45_s13 = int_to_ptr.hbm [resolvable:$true] %s44_s13 }
   0x8   :  { %28 = dma.hbm_to_vmem [thread:$0]  %s24_s8, 128, %s26_s10, [#allocation3]  }
   0x9   :  { %s421_s1 = smov [#allocation7]   ;;  %s57_s17 = sshll.u32 %s494_s3, 4  ;;  %s58_s17 = int_to_ptr.hbm [resolvable:$true] %s57_s17 }
   0xa   :  { %s46_s14 = sshll.u32 %s421_s1, 4  ;;  %s422_s18 = smov 128   ;;  %s47_s14 = int_to_ptr.vmem [resolvable:$true] %s46_s14 }
   0xb   :  { %s423_s0 = smov 8   ;;  %s424_s19 = smov [#allocation8]  }
   0xc   :  { %52 = dma.hbm_to_vmem [thread:$0]  %s45_s13, 2048, %s47_s14, [#allocation6], %s422_s18, %s422_s18, %s423_s0  }
   0xd   :  { %s59_s20 = sshll.u32 %s424_s19, 4  ;;  %s60_s20 = int_to_ptr.vmem [resolvable:$true] %s59_s20 }
   0xe   :  { %65 = dma.hbm_to_vmem [thread:$0]  %s58_s17, 2048, %s60_s20, [#allocation9], %s422_s18, %s422_s18, %s423_s0  }
   0xf   :  { %409 = dma.done.wait [#allocation3], 128  }
  0x10   :  { %410 = vsyncadd [#allocation3], 4294967168 }
  0x11   :  { %411 = dma.done.wait [#allocation6], 2176  }
  0x12   :  { %412 = vsyncadd [#allocation6], 4294965120 }
  0x13   :  { %413 = dma.done.wait [#allocation9], 2048  }
  0x14   :  { %414 = vsyncadd [#allocation9], 4294965248  ;;  %v117_v0 = vld [vmem:[#allocation7 + $0x78] sm:$0xff]  ;;  %v116_v2 = vld [vmem:[#allocation7 + $0x70] sm:$0xff]  ;;  %s425_s23 = smov [#allocation11]   ;;  %s206_s27 = sshll.u32 %s498_s7, 4  ;;  %s207_s27 = int_to_ptr.hbm [resolvable:$true] %s206_s27 }
  0x15   :  { %v156_v1 = vld [vmem:[#allocation8 + $0x78] sm:$0xff]  ;;  %223 = vmatpush.msra.mxu2 %v117_v0  ;;  %v155_v3 = vld [vmem:[#allocation8 + $0x70] sm:$0xff]  ;;  %v115_v4 = vld [vmem:[#allocation7 + $0x68] sm:$0xff]  ;;  %118 = vmatpush.msra.mxu0 %v117_v0  ;;  %s204_s24 = sshll.u32 %s425_s23, 4  ;;  %s426_s28 = smov [#allocation10]   ;;  %s205_s24 = int_to_ptr.vmem [resolvable:$true] %s204_s24 }
  0x16   :  { %239 = vmatpush.msra.mxu3 %v156_v1  ;;  %v154_v5 = vld [vmem:[#allocation8 + $0x68] sm:$0xff]  ;;  %157 = vmatpush.msra.mxu1 %v156_v1  ;;  %v114_v6 = vld [vmem:[#allocation7 + $0x60] sm:$0xff]  ;;  %v113_v8 = vld [vmem:[#allocation7 + $0x58] sm:$0xff]  ;;  %s193_s29 = sshll.u32 %s426_s28, 4  ;;  %s194_s29 = int_to_ptr.vmem [resolvable:$true] %s193_s29 }
  0x17   :  { %224 = vmatpush.msra.mxu2 %v116_v2  ;;  %v153_v7 = vld [vmem:[#allocation8 + $0x60] sm:$0xff]  ;;  %119 = vmatpush.msra.mxu0 %v116_v2  ;;  %v152_v9 = vld [vmem:[#allocation8 + $0x58] sm:$0xff]  ;;  %v112_v10 = vld [vmem:[#allocation7 + $0x50] sm:$0xff] }
  0x18   :  { %240 = vmatpush.msra.mxu3 %v155_v3  ;;  %158 = vmatpush.msra.mxu1 %v155_v3  ;;  %v151_v11 = vld [vmem:[#allocation8 + $0x50] sm:$0xff]  ;;  %v111_v12 = vld [vmem:[#allocation7 + $0x48] sm:$0xff]  ;;  %v110_v14 = vld [vmem:[#allocation7 + $0x40] sm:$0xff] }
  0x19   :  { %225 = vmatpush.msra.mxu2 %v115_v4  ;;  %120 = vmatpush.msra.mxu0 %v115_v4  ;;  %v150_v13 = vld [vmem:[#allocation8 + $0x48] sm:$0xff]  ;;  %v149_v15 = vld [vmem:[#allocation8 + $0x40] sm:$0xff]  ;;  %v109_v16 = vld [vmem:[#allocation7 + $0x38] sm:$0xff] }
  0x1a   :  { %241 = vmatpush.msra.mxu3 %v154_v5  ;;  %159 = vmatpush.msra.mxu1 %v154_v5  ;;  %v148_v17 = vld [vmem:[#allocation8 + $0x38] sm:$0xff]  ;;  %v108_v18 = vld [vmem:[#allocation7 + $0x30] sm:$0xff]  ;;  %v107_v20 = vld [vmem:[#allocation7 + $0x28] sm:$0xff] }
  0x1b   :  { %226 = vmatpush.msra.mxu2 %v114_v6  ;;  %121 = vmatpush.msra.mxu0 %v114_v6  ;;  %v147_v19 = vld [vmem:[#allocation8 + $0x30] sm:$0xff]  ;;  %v146_v21 = vld [vmem:[#allocation8 + $0x28] sm:$0xff]  ;;  %v106_v22 = vld [vmem:[#allocation7 + $0x20] sm:$0xff] }
  0x1c   :  { %242 = vmatpush.msra.mxu3 %v153_v7  ;;  %160 = vmatpush.msra.mxu1 %v153_v7  ;;  %v145_v23 = vld [vmem:[#allocation8 + $0x20] sm:$0xff]  ;;  %v105_v24 = vld [vmem:[#allocation7 + $0x18] sm:$0xff]  ;;  %v104_v26 = vld [vmem:[#allocation7 + $0x10] sm:$0xff] }
  0x1d   :  { %227 = vmatpush.msra.mxu2 %v113_v8  ;;  %122 = vmatpush.msra.mxu0 %v113_v8  ;;  %v144_v25 = vld [vmem:[#allocation8 + $0x18] sm:$0xff]  ;;  %v143_v27 = vld [vmem:[#allocation8 + $0x10] sm:$0xff]  ;;  %v103_v28 = vld [vmem:[#allocation7 + $0x8] sm:$0xff] }
  0x1e   :  { %243 = vmatpush.msra.mxu3 %v152_v9  ;;  %161 = vmatpush.msra.mxu1 %v152_v9  ;;  %v142_v29 = vld [vmem:[#allocation8 + $0x8] sm:$0xff]  ;;  %v102_v30 = vld [vmem:[#allocation7] sm:$0xff]  ;;  %v101_v32 = vld [vmem:[#allocation5] sm:$0xff] }
  0x1f   :  { %228 = vmatpush.msra.mxu2 %v112_v10  ;;  %123 = vmatpush.msra.mxu0 %v112_v10  ;;  %v141_v31 = vld [vmem:[#allocation8] sm:$0xff]  ;;  %v100_v33 = vld [vmem:[#allocation2] sm:$0xff] }
  0x20   :  { %244 = vmatpush.msra.mxu3 %v151_v11  ;;  %162 = vmatpush.msra.mxu1 %v151_v11  ;;  %v263_v36 = vld [vmem:[%s496_s5] ss:$0 sm:$0xff]  ;;  %s195_s5 = sshll.u32 %s497_s6, 4  ;;  %s196_s5 = int_to_ptr.hbm [resolvable:$true] %s195_s5 }
  0x21   :  { %229 = vmatpush.msra.mxu2 %v111_v12  ;;  %124 = vmatpush.msra.mxu0 %v111_v12  ;;  %v264_v37 = vld [vmem:[%s495_s4] ss:$0 sm:$0xff] }
  0x22   :  { %245 = vmatpush.msra.mxu3 %v150_v13  ;;  %163 = vmatpush.msra.mxu1 %v150_v13 }
  0x23   :  { %230 = vmatpush.msra.mxu2 %v110_v14  ;;  %125 = vmatpush.msra.mxu0 %v110_v14 }
  0x24   :  { %246 = vmatpush.msra.mxu3 %v149_v15  ;;  %164 = vmatpush.msra.mxu1 %v149_v15 }
  0x25   :  { %231 = vmatpush.msra.mxu2 %v109_v16  ;;  %126 = vmatpush.msra.mxu0 %v109_v16 }
  0x26   :  { %247 = vmatpush.msra.mxu3 %v148_v17  ;;  %165 = vmatpush.msra.mxu1 %v148_v17 }
  0x27   :  { %232 = vmatpush.msra.mxu2 %v108_v18  ;;  %127 = vmatpush.msra.mxu0 %v108_v18 }
  0x28   :  { %248 = vmatpush.msra.mxu3 %v147_v19  ;;  %166 = vmatpush.msra.mxu1 %v147_v19 }
  0x29   :  { %233 = vmatpush.msra.mxu2 %v107_v20  ;;  %128 = vmatpush.msra.mxu0 %v107_v20 }
  0x2a   :  { %249 = vmatpush.msra.mxu3 %v146_v21  ;;  %167 = vmatpush.msra.mxu1 %v146_v21 }
  0x2b   :  { %234 = vmatpush.msra.mxu2 %v106_v22  ;;  %129 = vmatpush.msra.mxu0 %v106_v22 }
  0x2c   :  { %250 = vmatpush.msra.mxu3 %v145_v23  ;;  %168 = vmatpush.msra.mxu1 %v145_v23 }
  0x2d   :  { %235 = vmatpush.msra.mxu2 %v105_v24  ;;  %130 = vmatpush.msra.mxu0 %v105_v24 }
  0x2e   :  { %251 = vmatpush.msra.mxu3 %v144_v25  ;;  %169 = vmatpush.msra.mxu1 %v144_v25 }
  0x2f   :  { %236 = vmatpush.msra.mxu2 %v104_v26  ;;  %131 = vmatpush.msra.mxu0 %v104_v26 }
  0x30   :  { %252 = vmatpush.msra.mxu3 %v143_v27  ;;  %170 = vmatpush.msra.mxu1 %v143_v27 }
  0x31   :  { %237 = vmatpush.msra.mxu2 %v103_v28  ;;  %132 = vmatpush.msra.mxu0 %v103_v28 }
  0x32   :  { %253 = vmatpush.msra.mxu3 %v142_v29  ;;  %171 = vmatpush.msra.mxu1 %v142_v29 }
  0x33   :  { %238 = vmatpush.msra.mxu2 %v102_v30  ;;  %133 = vmatpush.msra.mxu0 %v102_v30 }
  0x34   :  { %254 = vmatpush.msra.mxu3 %v141_v31  ;;  %137 = vmatmul.f32.vlgmr.msra.gmra.mxu2 %v101_v32 }
  0x35   :  { %176 = vmatmul.f32.vlgmr.msra.gmra.mxu3 %v101_v32  ;;  %172 = vmatpush.msra.mxu1 %v141_v31 }
  0x36   :  { %134 = vmatmul.f32.vlgmr.msra.gmra.mxu0 %v100_v33  ;;  %173 = vmatmul.f32.vlgmr.msra.gmra.mxu1 %v100_v33 }
  0xb3   :  { %v135_v34 = vpop.f32.mrf.mxu0  ;;  %v174_v35 = vpop.f32.mrf.mxu1 }
  0xb7   :  { %v138_v38 = vpop.f32.mrf.mxu2 }
  0xb8   :  { %v177_v39 = vpop.f32.mrf.mxu3  ;;  %v185_v40 = vadd.f32 %v174_v35, %v138_v38 }
  0xb9   :  { %v181_v41 = vsub.f32 %v135_v34, %v177_v39 }
  0xba   :  { %v186_v42 = vadd.f32 %v263_v36, %v185_v40 }
  0xbb   :  { %v182_v43 = vadd.f32 %v264_v37, %v181_v41 }
  0xbc   :  { %187 = vst [vmem:[#allocation11] sm:$0xff] %v186_v42 }
  0xbd   :  { %183 = vst [vmem:[#allocation10] sm:$0xff] %v182_v43  ;;  %209 = dma.vmem_to_hbm [thread:$0]  %s205_s24, 128, %s207_s27, [#allocation12]  }
  0xbe   :  { %198 = dma.vmem_to_hbm [thread:$0]  %s194_s29, 128, %s196_s5, [#allocation4]  }
  0xbf   :  { %415 = dma.done.wait [#allocation4], 128  }
  0xc0   :  { %416 = vsyncadd [#allocation4], 4294967168 }
  0xc1   :  { %417 = dma.done.wait [#allocation12], 128  }
  0xc2   :  { %418 = vsyncadd [#allocation12], 4294967168 }
  0xc3   :  { %218 = vsyncpa [#allocation3], 1 }
  0xc4   :  { %219 = vsyncpa [#allocation6], 1 }
  0xc5   :  { %220 = vsyncpa [#allocation9], 1 }
  0xc6   :  { %221 = vsyncpa [#allocation4], 1 }
  0xc7   :  { %222 = vsyncpa [#allocation12], 1 }

</bundles_post_ra>
